<compile_context>
chip_gen: v6e
topology: v6e:2x2x1
jax: 0.10.0
libtpu: 0.0.40
codegen_flags: <defaults>
</compile_context>

<pallas_src>
import functools

import jax
import jax.numpy as jnp
import numpy as np
from jax.experimental import pallas as pl
from jax.experimental.pallas import tpu as pltpu

# ----------------------------- model hyper-params -----------------------------
MARGIN = 1.0
ALPHA = 0.01
PD_EPS = 1e-6         # torch.nn.PairwiseDistance default eps (added to the difference)
POOL_EPS = 1e-8


def _round_up(x, m):
    return ((x + m - 1) // m) * m


def _vmem_budget_bytes():
    """~75% of this generation's per-core VMEM (re-derived for v7x's 64 MiB vs 128 MiB)."""
    cap = 64 * 1024 * 1024
    try:
        cap = int(getattr(pltpu.get_tpu_info(), "vmem_capacity_bytes", cap))
    except Exception:
        pass
    return max(32 * 1024 * 1024, (cap * 3) // 4)


def _choose_tiles(B, N, D, emb_itemsize, vmem_budget, target_step_bytes):
    """Pick (TB, TN, Npad, NK): batch tile, word-axis tile, padded word axis, #chunks."""
    # Batch tile: largest divisor of B <= 8, preferring an even grid extent so v7x's two
    # TensorCores get balanced work on the "parallel" axis.
    divisors = [t for t in range(1, min(B, 8) + 1) if B % t == 0]
    even_q = [t for t in divisors if (B // t) % 2 == 0]
    TB = max(even_q) if even_q else max(divisors)

    N8 = _round_up(N, 8)
    row_bytes = max(1, D * emb_itemsize)
    # rows/step so that TB * TN * D * itemsize ~= target_step_bytes (>= 1 MiB covers v7x HBM BW)
    want_rows = _round_up(max(8, -(-target_step_bytes // (TB * row_bytes))), 128)
    if want_rows >= N8:
        TN, Npad = N8, N8                 # single chunk: full (8-padded) word axis
    else:
        TN = want_rows                    # multiple of 128 (lane dim of the mask block)
        Npad = _round_up(N, TN)

    def vmem_usage(tn):                   # conservative (double-buffers everything)
        dp = _round_up(D, 128)
        return (2 * TB * tn * D * emb_itemsize
                + 2 * TB * 3 * _round_up(tn, 128) * emb_itemsize
                + 2 * TB * 8 * dp * 4                    # triples
                + 2 * 3 * _round_up(D, 8) * dp * 4       # weights (worst case 2 buffers)
                + 2 * 8 * 128 * 4                        # biases
                + 2 * TB * 8 * 128 * 4                   # output
                + TB * 8 * dp * 4 + TB * 8 * 128 * 4)    # accumulator scratch

    while vmem_usage(TN) > vmem_budget and TN > 128:
        TN = max(128, _round_up(TN // 2, 128))
        Npad = _round_up(N, TN)

    return TB, TN, Npad, Npad // TN


# -------------------------- one-time parameter prep ----------------------------
def prepare_params(raw):
    """Module-__init__ analogue: store the big word-embedding table in bf16 (so the per-forward
    gather streams bf16 directly, no convert pass) and pre-stack the projection weights/biases.
    """
    f32 = jnp.float32
    return {
        "word_emb": raw["word_emb"].astype(jnp.bfloat16),
        "entity_emb": raw["entity_emb"].astype(f32),
        "relation_emb": raw["relation_emb"].astype(f32),
        "w3": jnp.stack([raw["w_s"], raw["w_h"], raw["w_t"]], axis=0).astype(f32),   # (3, D, D)
        "b3": jnp.concatenate([raw["b_s"], raw["b_h"], raw["b_t"]], axis=0).astype(f32),  # (3, D)
    }


# ------------------------------- Pallas kernel --------------------------------
def _transtext_kernel(emb_ref, mask_ref, trip_ref, w_ref, b_ref,
                      out_ref, num_acc, den_acc,
                      *, d_true, batch, margin, alpha, pd_eps, pool_eps):
    nk = pl.program_id(1)

    # ---- init the per-batch-tile accumulators on the first word chunk ----
    @pl.when(nk == 0)
    def _():
        num_acc[...] = jnp.zeros_like(num_acc)
        den_acc[...] = jnp.zeros_like(den_acc)

    # ---- fused masked-pooling accumulate: one batched (3,TN)@(TN,D) MXU matmul ----
    m = mask_ref[...]                                     # (TB, 3, TN)  bf16 (0/1)
    e = emb_ref[...]                                      # (TB, TN, D)  bf16
    num_acc[...] += jnp.einsum("btn,bnd->btd", m, e,
                               preferred_element_type=jnp.float32)       # (TB, 3, D)
    den_acc[...] += jnp.sum(m.astype(jnp.float32), axis=2, keepdims=True)  # (TB, 3, 1)

    # ---- epilogue on the last chunk: encoder projections + loss terms ----
    @pl.when(nk == pl.num_programs(1) - 1)
    def _():
        pooled = num_acc[...] / (den_acc[...] + pool_eps)   # (TB, 3, D) f32
        bias = b_ref[...]                                   # (3, D)     f32

        feats = []
        for k in range(3):  # sentence / head / tail projections + tanh (f32 epilogue)
            feats.append(jnp.tanh(
                jnp.dot(pooled[:, k, :], w_ref[k],
                        preferred_element_type=jnp.float32) + bias[k:k + 1, :]))
        sfeat, hfeat, tfeat = feats                         # each (TB, D)

        trip = trip_ref[...]                                # (TB, 6, D) f32
        ph, pr, pt = trip[:, 0, :], trip[:, 1, :], trip[:, 2, :]
        nh, nr, nt = trip[:, 3, :], trip[:, 4, :], trip[:, 5, :]

        # PairwiseDistance(p=2) adds eps to the difference; D is un-padded so a scalar add is exact
        pd = ph + pr - pt + pd_eps
        nd = nh + nr - nt + pd_eps
        pos = jnp.sqrt(jnp.sum(pd * pd, axis=-1, keepdims=True))   # (TB, 1)
        neg = jnp.sqrt(jnp.sum(nd * nd, axis=-1, keepdims=True))
        hinge = jnp.maximum(pos - neg + margin, 0.0)

        sse = (jnp.sum((ph - hfeat) ** 2, axis=-1, keepdims=True)
               + jnp.sum((pt - tfeat) ** 2, axis=-1, keepdims=True)
               + jnp.sum((pr - sfeat) ** 2, axis=-1, keepdims=True))   # (TB, 1)

        # per-example contribution:  loss = sum_b hinge_b / B + alpha * sum_b sse_b / (B * B * D)
        contrib = hinge / float(batch) + alpha * sse / (float(batch) ** 2 * float(d_true))
        out_ref[...] = jnp.broadcast_to(contrib[:, :, None], out_ref.shape)


# ------------------------------- JAX wrapper -----------------------------------
def transtext_forward(params, posX, negX, posSentence,
                      sentenceMasking, headMasking, tailMasking,
                      *, single_buffer_weights=True, target_step_bytes=1 << 20):
    B, s_num, max_len = posSentence.shape
    N = s_num * max_len
    word_emb = params["word_emb"]                     # (V, D) bf16 (prep-time cast)
    D = int(word_emb.shape[1])
    emb_dtype = word_emb.dtype
    itemsize = jnp.dtype(emb_dtype).itemsize

    vmem_budget = _vmem_budget_bytes()
    TB, TN, Npad, NK = _choose_tiles(B, N, D, itemsize, vmem_budget, target_step_bytes)

    # ---- glue (outside the kernel): gathers, mask stacking, word-axis zero padding ----
    idx = posSentence.reshape(B, N)
    masks = jnp.stack([sentenceMasking.reshape(B, N),
                       headMasking.reshape(B, N),
                       tailMasking.reshape(B, N)], axis=1).astype(emb_dtype)   # (B, 3, N)
    if Npad != N:
        # Pad indices/masks (cheap, pre-gather) instead of padding the big emb tensor;
        # zero mask rows contribute nothing to numerator or denominator.
        idx = jnp.pad(idx, ((0, 0), (0, Npad - N)))
        masks = jnp.pad(masks, ((0, 0), (0, 0), (0, Npad - N)))

    emb = jnp.take(word_emb, idx, axis=0)             # (B, Npad, D) bf16 — no pad/convert pass

    ent, rel = params["entity_emb"], params["relation_emb"]
    trip = jnp.stack([jnp.take(ent, posX[:, 0], axis=0),
                      jnp.take(rel, posX[:, 1], axis=0),
                      jnp.take(ent, posX[:, 2], axis=0),
                      jnp.take(ent, negX[:, 0], axis=0),
                      jnp.take(rel, negX[:, 1], axis=0),
                      jnp.take(ent, negX[:, 2], axis=0)], axis=1).astype(jnp.float32)  # (B, 6, D)

    w3 = params["w3"].astype(jnp.float32)             # (3, D, D)
    b3 = params["b3"].astype(jnp.float32)             # (3, D)

    kernel = functools.partial(
        _transtext_kernel, d_true=D, batch=B,
        margin=MARGIN, alpha=ALPHA, pd_eps=PD_EPS, pool_eps=POOL_EPS)

    # Constant-index resident weight operands: single-buffer them to halve their VMEM cost.
    weight_mode = {"pipeline_mode": pl.Buffered(1)} if single_buffer_weights else {}

    grid_spec = pltpu.PrefetchScalarGridSpec(
        num_scalar_prefetch=0,
        grid=(B // TB, NK),                                              # (batch tiles, chunks)
        in_specs=[
            pl.BlockSpec((TB, TN, D), lambda b, nk: (b, nk, 0)),         # emb     (bf16)
            pl.BlockSpec((TB, 3, TN), lambda b, nk: (b, 0, nk)),         # masks   (bf16)
            pl.BlockSpec((TB, 6, D), lambda b, nk: (b, 0, 0)),           # triples (f32)
            pl.BlockSpec((3, D, D), lambda b, nk: (0, 0, 0), **weight_mode),  # stacked weights
            pl.BlockSpec((3, D), lambda b, nk: (0, 0), **weight_mode),        # stacked biases
        ],
        out_specs=pl.BlockSpec((TB, 1, 128), lambda b, nk: (b, 0, 0)),   # lane-dense scalar slab
        scratch_shapes=[pltpu.VMEM((TB, 3, D), jnp.float32),             # pooled numerators
                        pltpu.VMEM((TB, 3, 1), jnp.float32)],            # pooled denominators
    )

    flops = 2 * B * 3 * Npad * D + 2 * B * 3 * D * D
    bytes_accessed = (emb.size * itemsize + masks.size * itemsize
                      + trip.size * 4 + w3.size * 4 + b3.size * 4 + B * 128 * 4)
    cost = pl.CostEstimate(flops=flops, transcendentals=3 * B * D,
                           bytes_accessed=bytes_accessed)

    out = pl.pallas_call(
        kernel,
        grid_spec=grid_spec,
        out_shape=jax.ShapeDtypeStruct((B, 1, 128), jnp.float32),
        compiler_params=pltpu.CompilerParams(
            dimension_semantics=("parallel", "arbitrary"),
            vmem_limit_bytes=vmem_budget),
        cost_estimate=cost,
    )(emb, masks, trip, w3, b3)

    return jnp.sum(out[:, 0, 0])


# ------------------------- pure-JAX reference (sanity) --------------------------
def transtext_forward_ref(params, posX, negX, posSentence, sentenceMasking, headMasking, tailMasking):
    B, s_num, max_len = posSentence.shape
    N = s_num * max_len
    f32 = jnp.float32

    emb = jnp.take(params["word_emb"], posSentence.reshape(B, N), axis=0).astype(f32)
    w3 = params["w3"].astype(f32)
    b3 = params["b3"].astype(f32)

    def encode(mask, k):
        m = mask.reshape(B, N).astype(f32)
        num = jnp.einsum("bn,bnd->bd", m, emb)
        den = jnp.sum(m, axis=1, keepdims=True) + POOL_EPS
        return jnp.tanh((num / den) @ w3[k] + b3[k][None, :])

    sfeat = encode(sentenceMasking, 0)
    hfeat = encode(headMasking, 1)
    tfeat = encode(tailMasking, 2)

    def triple(x):
        h = jnp.take(params["entity_emb"], x[:, 0], axis=0).astype(f32)
        r = jnp.take(params["relation_emb"], x[:, 1], axis=0).astype(f32)
        t = jnp.take(params["entity_emb"], x[:, 2], axis=0).astype(f32)
        return h, r, t

    ph, pr, pt = triple(posX)
    nh, nr, nt = triple(negX)

    pos_score = jnp.sqrt(jnp.sum((ph + pr - pt + PD_EPS) ** 2, axis=1))
    neg_score = jnp.sqrt(jnp.sum((nh + nr - nt + PD_EPS) ** 2, axis=1))

    mse_head = jnp.mean((ph - hfeat) ** 2)
    mse_tail = jnp.mean((pt - tfeat) ** 2)
    mse_rel = jnp.mean((pr - sfeat) ** 2)

    loss_entity = jnp.sum(jax.nn.relu(pos_score - neg_score + MARGIN)) / B
    return loss_entity + (mse_head + mse_tail + mse_rel) / B * ALPHA


# ------------------------------------ main --------------------------------------
if __name__ == "__main__":
    key = jax.random.PRNGKey(0)
    ks = jax.random.split(key, 16)

    B, S_NUM, MAX_LEN, D = 2, 2, 8, 32
    N_WORDS, N_ENT, N_REL = 50, 20, 10

    raw_params = {
        "word_emb": jax.random.normal(ks[0], (N_WORDS, D), jnp.float32) * 0.1,
        "entity_emb": jax.random.normal(ks[1], (N_ENT, D), jnp.float32) * 0.1,
        "relation_emb": jax.random.normal(ks[2], (N_REL, D), jnp.float32) * 0.1,
        "w_s": jax.random.normal(ks[3], (D, D), jnp.float32) * 0.1,
        "w_h": jax.random.normal(ks[4], (D, D), jnp.float32) * 0.1,
        "w_t": jax.random.normal(ks[5], (D, D), jnp.float32) * 0.1,
        "b_s": jnp.zeros((1, D), jnp.float32),
        "b_h": jnp.zeros((1, D), jnp.float32),
        "b_t": jnp.zeros((1, D), jnp.float32),
    }
    params = prepare_params(raw_params)

    posX = jnp.stack([jax.random.randint(ks[6], (B,), 0, N_ENT),
                      jax.random.randint(ks[7], (B,), 0, N_REL),
                      jax.random.randint(ks[8], (B,), 0, N_ENT)], axis=1).astype(jnp.int32)
    negX = jnp.stack([jax.random.randint(ks[9], (B,), 0, N_ENT),
                      jax.random.randint(ks[7], (B,), 0, N_REL),
                      jax.random.randint(ks[10], (B,), 0, N_ENT)], axis=1).astype(jnp.int32)

    def make_text(s_num, max_len):
        sent = jax.random.randint(ks[11], (B, s_num, max_len), 0, N_WORDS).astype(jnp.int32)
        sm = (jax.random.uniform(ks[12], (B, s_num, max_len)) > 0.2).astype(jnp.float32)
        hm = (jax.random.uniform(ks[13], (B, s_num, max_len)) > 0.7).astype(jnp.float32)
        tm = (jax.random.uniform(ks[14], (B, s_num, max_len)) > 0.7).astype(jnp.float32)
        return sent, sm, hm, tm

    def run(fwd_kwargs, text):
        fwd = jax.jit(functools.partial(transtext_forward, **fwd_kwargs))
        return jax.block_until_ready(fwd(params, posX, negX, *text))

    # 1) default config (single-buffered resident weights, big per-step tiles); fall back to
    #    default double-buffering if this Pallas build rejects pl.Buffered(1).
    text1 = make_text(S_NUM, MAX_LEN)
    try:
        loss1 = run({"single_buffer_weights": True}, text1)
    except Exception:
        loss1 = run({"single_buffer_weights": False}, text1)
    ref1 = jax.block_until_ready(transtext_forward_ref(params, posX, negX, *text1))
    np.testing.assert_allclose(np.asarray(loss1), np.asarray(ref1), rtol=1e-4, atol=1e-5)

    # 2) exercise the chunked + zero-padded word-axis path (NK > 1, N % TN != 0) by shrinking
    #    the per-step byte target so the toy shapes still tile.
    text2 = make_text(2, 200)     # N = 400 -> TN = 128, Npad = 512, NK = 4
    try:
        loss2 = run({"single_buffer_weights": True, "target_step_bytes": 4096}, text2)
    except Exception:
        loss2 = run({"single_buffer_weights": False, "target_step_bytes": 4096}, text2)
    ref2 = jax.block_until_ready(transtext_forward_ref(params, posX, negX, *text2))
    np.testing.assert_allclose(np.asarray(loss2), np.asarray(ref2), rtol=1e-4, atol=1e-5)

    print("KERNEL_OK")
</pallas_src>

<mosaic_0001>
module attributes {stable_mosaic.version = 11 : i64} {
  func.func @_transtext_kernel(%arg0: i32, %arg1: i32, %arg2: memref<1x16x32xbf16, #tpu.memory_space<vmem>>, %arg3: memref<1x3x16xbf16, #tpu.memory_space<vmem>>, %arg4: memref<1x6x32xf32, #tpu.memory_space<vmem>>, %arg5: memref<3x32x32xf32, #tpu.memory_space<vmem>>, %arg6: memref<3x32xf32, #tpu.memory_space<vmem>>, %arg7: memref<1x1x128xf32, #tpu.memory_space<vmem>>, %arg8: memref<1x3x32xf32, #tpu.memory_space<vmem>>, %arg9: memref<1x3x1xf32, #tpu.memory_space<vmem>>) attributes {dimension_semantics = [#tpu.dimension_semantics<parallel>, #tpu.dimension_semantics<arbitrary>], iteration_bounds = array<i64: 2, 1>, scalar_prefetch = 0 : i64, scratch_operands = 2 : i64, tpu.core_type = #tpu.core_type<tc>, window_params = [{transform_indices = @transform_0, window_bounds = array<i64: 1, 16, 32>}, {transform_indices = @transform_1, window_bounds = array<i64: 1, 3, 16>}, {transform_indices = @transform_2, window_bounds = array<i64: 1, 6, 32>}, {pipeline_mode = #tpu.pipeline_mode<synchronous>, transform_indices = @transform_3, window_bounds = array<i64: 3, 32, 32>}, {pipeline_mode = #tpu.pipeline_mode<synchronous>, transform_indices = @transform_4, window_bounds = array<i64: 3, 32>}, {transform_indices = @transform_5, window_bounds = array<i64: 1, 1, 128>}]} {
    %c0_i32 = arith.constant 0 : i32
    %0 = arith.cmpi eq, %arg1, %c0_i32 : i32
    %1 = arith.extui %0 : i1 to i32
    %c0_i32_0 = arith.constant 0 : i32
    %2 = arith.cmpi ne, %1, %c0_i32_0 : i32
    scf.if %2 {
      %cst_21 = arith.constant 0.000000e+00 : f32
      %18 = vector.broadcast %cst_21 : f32 to vector<1x3x32xf32>
      %c0_22 = arith.constant 0 : index
      %c0_23 = arith.constant 0 : index
      %c0_24 = arith.constant 0 : index
      %19 = vector.load %arg8[%c0_22, %c0_23, %c0_24] : memref<1x3x32xf32, #tpu.memory_space<vmem>>, vector<1x3x32xf32>
      tpu.vector_store %arg8[%c0_22, %c0_23, %c0_24], %18 {strides = array<i32>} : memref<1x3x32xf32, #tpu.memory_space<vmem>>, vector<1x3x32xf32>,
      %cst_25 = arith.constant 0.000000e+00 : f32
      %20 = vector.broadcast %cst_25 : f32 to vector<1x3x1xf32>
      %c0_26 = arith.constant 0 : index
      %c0_27 = arith.constant 0 : index
      %c0_28 = arith.constant 0 : index
      %21 = vector.load %arg9[%c0_26, %c0_27, %c0_28] : memref<1x3x1xf32, #tpu.memory_space<vmem>>, vector<1x3x1xf32>
      tpu.vector_store %arg9[%c0_26, %c0_27, %c0_28], %20 {strides = array<i32>} : memref<1x3x1xf32, #tpu.memory_space<vmem>>, vector<1x3x1xf32>,
    } else {
    }
    %c0 = arith.constant 0 : index
    %c0_1 = arith.constant 0 : index
    %c0_2 = arith.constant 0 : index
    %3 = vector.load %arg3[%c0, %c0_1, %c0_2] : memref<1x3x16xbf16, #tpu.memory_space<vmem>>, vector<1x3x16xbf16>
    %c0_3 = arith.constant 0 : index
    %c0_4 = arith.constant 0 : index
    %c0_5 = arith.constant 0 : index
    %4 = vector.load %arg2[%c0_3, %c0_4, %c0_5] : memref<1x16x32xbf16, #tpu.memory_space<vmem>>, vector<1x16x32xbf16>
    %c0_6 = arith.constant 0 : index
    %c0_7 = arith.constant 0 : index
    %c0_8 = arith.constant 0 : index
    %5 = vector.load %arg8[%c0_6, %c0_7, %c0_8] : memref<1x3x32xf32, #tpu.memory_space<vmem>>, vector<1x3x32xf32>
    "tpu.trace_start"() <{level = 10 : i32, message = "btn,bnd->btd"}> : () -> ()
    %cst = arith.constant dense<0.000000e+00> : vector<1x3x32xf32>
    %6 = tpu.matmul %3, %4, %cst {dimension_numbers = #tpu.dot_dimension_numbers<[2], [1], [1], [2], [0, 0, 0, 1, 1, 2], [0], [0]>} : vector<1x3x16xbf16>, vector<1x16x32xbf16>, vector<1x3x32xf32> -> vector<1x3x32xf32>
    "tpu.trace_stop"() : () -> ()
    %7 = arith.addf %5, %6 : vector<1x3x32xf32>
    %c0_9 = arith.constant 0 : index
    %c0_10 = arith.constant 0 : index
    %c0_11 = arith.constant 0 : index
    %8 = vector.load %arg8[%c0_9, %c0_10, %c0_11] : memref<1x3x32xf32, #tpu.memory_space<vmem>>, vector<1x3x32xf32>
    tpu.vector_store %arg8[%c0_9, %c0_10, %c0_11], %7 {strides = array<i32>} : memref<1x3x32xf32, #tpu.memory_space<vmem>>, vector<1x3x32xf32>,
    %c0_12 = arith.constant 0 : index
    %c0_13 = arith.constant 0 : index
    %c0_14 = arith.constant 0 : index
    %9 = vector.load %arg9[%c0_12, %c0_13, %c0_14] : memref<1x3x1xf32, #tpu.memory_space<vmem>>, vector<1x3x1xf32>
    %10 = arith.extf %3 : vector<1x3x16xbf16> to vector<1x3x16xf32>
    %cst_15 = arith.constant dense<0.000000e+00> : vector<1x3xf32>
    %11 = vector.multi_reduction <add>, %10, %cst_15 [2] : vector<1x3x16xf32> to vector<1x3xf32>
    %12 = vector.shape_cast %11 : vector<1x3xf32> to vector<1x3x1xf32>
    %13 = arith.addf %9, %12 : vector<1x3x1xf32>
    %c0_16 = arith.constant 0 : index
    %c0_17 = arith.constant 0 : index
    %c0_18 = arith.constant 0 : index
    %14 = vector.load %arg9[%c0_16, %c0_17, %c0_18] : memref<1x3x1xf32, #tpu.memory_space<vmem>>, vector<1x3x1xf32>
    tpu.vector_store %arg9[%c0_16, %c0_17, %c0_18], %13 {strides = array<i32>} : memref<1x3x1xf32, #tpu.memory_space<vmem>>, vector<1x3x1xf32>,
    %c0_i32_19 = arith.constant 0 : i32
    %15 = arith.cmpi eq, %arg1, %c0_i32_19 : i32
    %16 = arith.extui %15 : i1 to i32
    %c0_i32_20 = arith.constant 0 : i32
    %17 = arith.cmpi ne, %16, %c0_i32_20 : i32
    scf.if %17 {
      %c0_21 = arith.constant 0 : index
      %c0_22 = arith.constant 0 : index
      %c0_23 = arith.constant 0 : index
      %18 = vector.load %arg8[%c0_21, %c0_22, %c0_23] : memref<1x3x32xf32, #tpu.memory_space<vmem>>, vector<1x3x32xf32>
      %c0_24 = arith.constant 0 : index
      %c0_25 = arith.constant 0 : index
      %c0_26 = arith.constant 0 : index
      %19 = vector.load %arg9[%c0_24, %c0_25, %c0_26] : memref<1x3x1xf32, #tpu.memory_space<vmem>>, vector<1x3x1xf32>
      %cst_27 = arith.constant 9.99999993E-9 : f32
      %20 = vector.broadcast %cst_27 : f32 to vector<1x3x1xf32>
      %21 = arith.addf %19, %20 : vector<1x3x1xf32>
      %22 = vector.broadcast %21 : vector<1x3x1xf32> to vector<1x3x32xf32>
      %23 = arith.divf %18, %22 : vector<1x3x32xf32>
      %c0_28 = arith.constant 0 : index
      %c0_29 = arith.constant 0 : index
      %24 = vector.load %arg6[%c0_28, %c0_29] : memref<3x32xf32, #tpu.memory_space<vmem>>, vector<3x32xf32>
      %25 = vector.extract_strided_slice %23 {offsets = [0, 0, 0], sizes = [1, 1, 32], strides = [1, 1, 1]} : vector<1x3x32xf32> to vector<1x1x32xf32>
      %26 = vector.shape_cast %25 : vector<1x1x32xf32> to vector<1x32xf32>
      %c0_30 = arith.constant 0 : index
      %c0_31 = arith.constant 0 : index
      %c0_32 = arith.constant 0 : index
      %27 = vector.load %arg5[%c0_30, %c0_31, %c0_32] : memref<3x32x32xf32, #tpu.memory_space<vmem>>, vector<1x32x32xf32>
      %28 = vector.shape_cast %27 : vector<1x32x32xf32> to vector<32x32xf32>
      %cst_33 = arith.constant dense<0.000000e+00> : vector<1x32xf32>
      %29 = tpu.matmul %26, %28, %cst_33 {dimension_numbers = #tpu.dot_dimension_numbers<[1], [0], [0], [1], [0, 0, 1, 1], [], []>} : vector<1x32xf32>, vector<32x32xf32>, vector<1x32xf32> -> vector<1x32xf32>
      %30 = vector.extract_strided_slice %24 {offsets = [0, 0], sizes = [1, 32], strides = [1, 1]} : vector<3x32xf32> to vector<1x32xf32>
      %31 = arith.addf %29, %30 : vector<1x32xf32>
      %32 = math.tanh %31 : vector<1x32xf32>
      %33 = vector.extract_strided_slice %23 {offsets = [0, 1, 0], sizes = [1, 1, 32], strides = [1, 1, 1]} : vector<1x3x32xf32> to vector<1x1x32xf32>
      %34 = vector.shape_cast %33 : vector<1x1x32xf32> to vector<1x32xf32>
      %c1 = arith.constant 1 : index
      %c0_34 = arith.constant 0 : index
      %c0_35 = arith.constant 0 : index
      %35 = vector.load %arg5[%c1, %c0_34, %c0_35] : memref<3x32x32xf32, #tpu.memory_space<vmem>>, vector<1x32x32xf32>
      %36 = vector.shape_cast %35 : vector<1x32x32xf32> to vector<32x32xf32>
      %cst_36 = arith.constant dense<0.000000e+00> : vector<1x32xf32>
      %37 = tpu.matmul %34, %36, %cst_36 {dimension_numbers = #tpu.dot_dimension_numbers<[1], [0], [0], [1], [0, 0, 1, 1], [], []>} : vector<1x32xf32>, vector<32x32xf32>, vector<1x32xf32> -> vector<1x32xf32>
      %38 = vector.extract_strided_slice %24 {offsets = [1, 0], sizes = [1, 32], strides = [1, 1]} : vector<3x32xf32> to vector<1x32xf32>
      %39 = arith.addf %37, %38 : vector<1x32xf32>
      %40 = math.tanh %39 : vector<1x32xf32>
      %41 = vector.extract_strided_slice %23 {offsets = [0, 2, 0], sizes = [1, 1, 32], strides = [1, 1, 1]} : vector<1x3x32xf32> to vector<1x1x32xf32>
      %42 = vector.shape_cast %41 : vector<1x1x32xf32> to vector<1x32xf32>
      %c2 = arith.constant 2 : index
      %c0_37 = arith.constant 0 : index
      %c0_38 = arith.constant 0 : index
      %43 = vector.load %arg5[%c2, %c0_37, %c0_38] : memref<3x32x32xf32, #tpu.memory_space<vmem>>, vector<1x32x32xf32>
      %44 = vector.shape_cast %43 : vector<1x32x32xf32> to vector<32x32xf32>
      %cst_39 = arith.constant dense<0.000000e+00> : vector<1x32xf32>
      %45 = tpu.matmul %42, %44, %cst_39 {dimension_numbers = #tpu.dot_dimension_numbers<[1], [0], [0], [1], [0, 0, 1, 1], [], []>} : vector<1x32xf32>, vector<32x32xf32>, vector<1x32xf32> -> vector<1x32xf32>
      %46 = vector.extract_strided_slice %24 {offsets = [2, 0], sizes = [1, 32], strides = [1, 1]} : vector<3x32xf32> to vector<1x32xf32>
      %47 = arith.addf %45, %46 : vector<1x32xf32>
      %48 = math.tanh %47 : vector<1x32xf32>
      %c0_40 = arith.constant 0 : index
      %c0_41 = arith.constant 0 : index
      %c0_42 = arith.constant 0 : index
      %49 = vector.load %arg4[%c0_40, %c0_41, %c0_42] : memref<1x6x32xf32, #tpu.memory_space<vmem>>, vector<1x6x32xf32>
      %50 = vector.extract_strided_slice %49 {offsets = [0, 0, 0], sizes = [1, 1, 32], strides = [1, 1, 1]} : vector<1x6x32xf32> to vector<1x1x32xf32>
      %51 = vector.shape_cast %50 : vector<1x1x32xf32> to vector<1x32xf32>
      %52 = vector.extract_strided_slice %49 {offsets = [0, 1, 0], sizes = [1, 1, 32], strides = [1, 1, 1]} : vector<1x6x32xf32> to vector<1x1x32xf32>
      %53 = vector.shape_cast %52 : vector<1x1x32xf32> to vector<1x32xf32>
      %54 = vector.extract_strided_slice %49 {offsets = [0, 2, 0], sizes = [1, 1, 32], strides = [1, 1, 1]} : vector<1x6x32xf32> to vector<1x1x32xf32>
      %55 = vector.shape_cast %54 : vector<1x1x32xf32> to vector<1x32xf32>
      %56 = vector.extract_strided_slice %49 {offsets = [0, 3, 0], sizes = [1, 1, 32], strides = [1, 1, 1]} : vector<1x6x32xf32> to vector<1x1x32xf32>
      %57 = vector.shape_cast %56 : vector<1x1x32xf32> to vector<1x32xf32>
      %58 = vector.extract_strided_slice %49 {offsets = [0, 4, 0], sizes = [1, 1, 32], strides = [1, 1, 1]} : vector<1x6x32xf32> to vector<1x1x32xf32>
      %59 = vector.shape_cast %58 : vector<1x1x32xf32> to vector<1x32xf32>
      %60 = vector.extract_strided_slice %49 {offsets = [0, 5, 0], sizes = [1, 1, 32], strides = [1, 1, 1]} : vector<1x6x32xf32> to vector<1x1x32xf32>
      %61 = vector.shape_cast %60 : vector<1x1x32xf32> to vector<1x32xf32>
      %62 = arith.addf %51, %53 : vector<1x32xf32>
      %63 = arith.subf %62, %55 : vector<1x32xf32>
      %cst_43 = arith.constant 9.99999997E-7 : f32
      %64 = vector.broadcast %cst_43 : f32 to vector<1x32xf32>
      %65 = arith.addf %63, %64 : vector<1x32xf32>
      %66 = arith.addf %57, %59 : vector<1x32xf32>
      %67 = arith.subf %66, %61 : vector<1x32xf32>
      %cst_44 = arith.constant 9.99999997E-7 : f32
      %68 = vector.broadcast %cst_44 : f32 to vector<1x32xf32>
      %69 = arith.addf %67, %68 : vector<1x32xf32>
      %70 = arith.mulf %65, %65 : vector<1x32xf32>
      %cst_45 = arith.constant dense<0.000000e+00> : vector<1xf32>
      %71 = vector.multi_reduction <add>, %70, %cst_45 [1] : vector<1x32xf32> to vector<1xf32>
      %72 = vector.shape_cast %71 : vector<1xf32> to vector<1x1xf32>
      %73 = math.sqrt %72 : vector<1x1xf32>
      %74 = arith.mulf %69, %69 : vector<1x32xf32>
      %cst_46 = arith.constant dense<0.000000e+00> : vector<1xf32>
      %75 = vector.multi_reduction <add>, %74, %cst_46 [1] : vector<1x32xf32> to vector<1xf32>
      %76 = vector.shape_cast %75 : vector<1xf32> to vector<1x1xf32>
      %77 = math.sqrt %76 : vector<1x1xf32>
      %78 = arith.subf %73, %77 : vector<1x1xf32>
      %cst_47 = arith.constant 1.000000e+00 : f32
      %79 = vector.broadcast %cst_47 : f32 to vector<1x1xf32>
      %80 = arith.addf %78, %79 : vector<1x1xf32>
      %cst_48 = arith.constant 0.000000e+00 : f32
      %81 = vector.broadcast %cst_48 : f32 to vector<1x1xf32>
      %82 = arith.maximumf %80, %81 : vector<1x1xf32>
      %83 = arith.subf %51, %40 : vector<1x32xf32>
      %84 = arith.mulf %83, %83 : vector<1x32xf32>
      %cst_49 = arith.constant dense<0.000000e+00> : vector<1xf32>
      %85 = vector.multi_reduction <add>, %84, %cst_49 [1] : vector<1x32xf32> to vector<1xf32>
      %86 = vector.shape_cast %85 : vector<1xf32> to vector<1x1xf32>
      %87 = arith.subf %55, %48 : vector<1x32xf32>
      %88 = arith.mulf %87, %87 : vector<1x32xf32>
      %cst_50 = arith.constant dense<0.000000e+00> : vector<1xf32>
      %89 = vector.multi_reduction <add>, %88, %cst_50 [1] : vector<1x32xf32> to vector<1xf32>
      %90 = vector.shape_cast %89 : vector<1xf32> to vector<1x1xf32>
      %91 = arith.addf %86, %90 : vector<1x1xf32>
      %92 = arith.subf %53, %32 : vector<1x32xf32>
      %93 = arith.mulf %92, %92 : vector<1x32xf32>
      %cst_51 = arith.constant dense<0.000000e+00> : vector<1xf32>
      %94 = vector.multi_reduction <add>, %93, %cst_51 [1] : vector<1x32xf32> to vector<1xf32>
      %95 = vector.shape_cast %94 : vector<1xf32> to vector<1x1xf32>
      %96 = arith.addf %91, %95 : vector<1x1xf32>
      %cst_52 = arith.constant 2.000000e+00 : f32
      %97 = vector.broadcast %cst_52 : f32 to vector<1x1xf32>
      %98 = arith.divf %82, %97 : vector<1x1xf32>
      %cst_53 = arith.constant 0.00999999977 : f32
      %99 = vector.broadcast %cst_53 : f32 to vector<1x1xf32>
      %100 = arith.mulf %99, %96 : vector<1x1xf32>
      %cst_54 = arith.constant 1.280000e+02 : f32
      %101 = vector.broadcast %cst_54 : f32 to vector<1x1xf32>
      %102 = arith.divf %100, %101 : vector<1x1xf32>
      %103 = arith.addf %98, %102 : vector<1x1xf32>
      %104 = vector.shape_cast %103 : vector<1x1xf32> to vector<1x1x1xf32>
      %105 = vector.shape_cast %104 : vector<1x1x1xf32> to vector<1x1x1xf32>
      %106 = vector.broadcast %105 : vector<1x1x1xf32> to vector<1x1x128xf32>
      %c0_55 = arith.constant 0 : index
      %c0_56 = arith.constant 0 : index
      %c0_57 = arith.constant 0 : index
      %107 = vector.load %arg7[%c0_55, %c0_56, %c0_57] : memref<1x1x128xf32, #tpu.memory_space<vmem>>, vector<1x1x128xf32>
      tpu.vector_store %arg7[%c0_55, %c0_56, %c0_57], %106 {strides = array<i32>} : memref<1x1x128xf32, #tpu.memory_space<vmem>>, vector<1x1x128xf32>,
    } else {
    }
    return
  }
  func.func @transform_0(%arg0: i32, %arg1: i32) -> (i32, i32, i32) {
    %c0_i32 = arith.constant 0 : i32
    %c0_i32_0 = arith.constant 0 : i32
    return %arg0, %arg1, %c0_i32 : i32, i32, i32
  }
  func.func @transform_1(%arg0: i32, %arg1: i32) -> (i32, i32, i32) {
    %c0_i32 = arith.constant 0 : i32
    %c0_i32_0 = arith.constant 0 : i32
    return %arg0, %c0_i32, %arg1 : i32, i32, i32
  }
  func.func @transform_2(%arg0: i32, %arg1: i32) -> (i32, i32, i32) {
    %c0_i32 = arith.constant 0 : i32
    %c0_i32_0 = arith.constant 0 : i32
    %c0_i32_1 = arith.constant 0 : i32
    return %arg0, %c0_i32, %c0_i32_0 : i32, i32, i32
  }
  func.func @transform_3(%arg0: i32, %arg1: i32) -> (i32, i32, i32) {
    %c0_i32 = arith.constant 0 : i32
    %c0_i32_0 = arith.constant 0 : i32
    %c0_i32_1 = arith.constant 0 : i32
    %c0_i32_2 = arith.constant 0 : i32
    return %c0_i32, %c0_i32_0, %c0_i32_1 : i32, i32, i32
  }
  func.func @transform_4(%arg0: i32, %arg1: i32) -> (i32, i32) {
    %c0_i32 = arith.constant 0 : i32
    %c0_i32_0 = arith.constant 0 : i32
    %c0_i32_1 = arith.constant 0 : i32
    return %c0_i32, %c0_i32_0 : i32, i32
  }
  func.func @transform_5(%arg0: i32, %arg1: i32) -> (i32, i32, i32) {
    %c0_i32 = arith.constant 0 : i32
    %c0_i32_0 = arith.constant 0 : i32
    %c0_i32_1 = arith.constant 0 : i32
    return %arg0, %c0_i32, %c0_i32_0 : i32, i32, i32
  }
}

module attributes {stable_mosaic.version = 11 : i64} {
  func.func @_transtext_kernel(%arg0: i32, %arg1: i32, %arg2: memref<1x16x32xbf16, #tpu.memory_space<vmem>>, %arg3: memref<1x3x16xbf16, #tpu.memory_space<vmem>>, %arg4: memref<1x6x32xf32, #tpu.memory_space<vmem>>, %arg5: memref<3x32x32xf32, #tpu.memory_space<vmem>>, %arg6: memref<3x32xf32, #tpu.memory_space<vmem>>, %arg7: memref<1x1x128xf32, #tpu.memory_space<vmem>>, %arg8: memref<1x3x32xf32, #tpu.memory_space<vmem>>, %arg9: memref<1x3x1xf32, #tpu.memory_space<vmem>>) attributes {dimension_semantics = [#tpu.dimension_semantics<parallel>, #tpu.dimension_semantics<arbitrary>], iteration_bounds = array<i64: 2, 1>, scalar_prefetch = 0 : i64, scratch_operands = 2 : i64, tpu.core_type = #tpu.core_type<tc>, window_params = [{transform_indices = @transform_0, window_bounds = array<i64: 1, 16, 32>}, {transform_indices = @transform_1, window_bounds = array<i64: 1, 3, 16>}, {transform_indices = @transform_2, window_bounds = array<i64: 1, 6, 32>}, {pipeline_mode = #tpu.pipeline_mode<synchronous>, transform_indices = @transform_3, window_bounds = array<i64: 3, 32, 32>}, {pipeline_mode = #tpu.pipeline_mode<synchronous>, transform_indices = @transform_4, window_bounds = array<i64: 3, 32>}, {transform_indices = @transform_5, window_bounds = array<i64: 1, 1, 128>}]} {
    %c0_i32 = arith.constant 0 : i32
    %0 = arith.cmpi eq, %arg1, %c0_i32 : i32
    %1 = arith.extui %0 : i1 to i32
    %c0_i32_0 = arith.constant 0 : i32
    %2 = arith.cmpi ne, %1, %c0_i32_0 : i32
    scf.if %2 {
      %cst_21 = arith.constant 0.000000e+00 : f32
      %18 = vector.broadcast %cst_21 : f32 to vector<1x3x32xf32>
      %c0_22 = arith.constant 0 : index
      %c0_23 = arith.constant 0 : index
      %c0_24 = arith.constant 0 : index
      %19 = vector.load %arg8[%c0_22, %c0_23, %c0_24] : memref<1x3x32xf32, #tpu.memory_space<vmem>>, vector<1x3x32xf32>
      tpu.vector_store %arg8[%c0_22, %c0_23, %c0_24], %18 {strides = array<i32>} : memref<1x3x32xf32, #tpu.memory_space<vmem>>, vector<1x3x32xf32>,
      %cst_25 = arith.constant 0.000000e+00 : f32
      %20 = vector.broadcast %cst_25 : f32 to vector<1x3x1xf32>
      %c0_26 = arith.constant 0 : index
      %c0_27 = arith.constant 0 : index
      %c0_28 = arith.constant 0 : index
      %21 = vector.load %arg9[%c0_26, %c0_27, %c0_28] : memref<1x3x1xf32, #tpu.memory_space<vmem>>, vector<1x3x1xf32>
      tpu.vector_store %arg9[%c0_26, %c0_27, %c0_28], %20 {strides = array<i32>} : memref<1x3x1xf32, #tpu.memory_space<vmem>>, vector<1x3x1xf32>,
    } else {
    }
    %c0 = arith.constant 0 : index
    %c0_1 = arith.constant 0 : index
    %c0_2 = arith.constant 0 : index
    %3 = vector.load %arg3[%c0, %c0_1, %c0_2] : memref<1x3x16xbf16, #tpu.memory_space<vmem>>, vector<1x3x16xbf16>
    %c0_3 = arith.constant 0 : index
    %c0_4 = arith.constant 0 : index
    %c0_5 = arith.constant 0 : index
    %4 = vector.load %arg2[%c0_3, %c0_4, %c0_5] : memref<1x16x32xbf16, #tpu.memory_space<vmem>>, vector<1x16x32xbf16>
    %c0_6 = arith.constant 0 : index
    %c0_7 = arith.constant 0 : index
    %c0_8 = arith.constant 0 : index
    %5 = vector.load %arg8[%c0_6, %c0_7, %c0_8] : memref<1x3x32xf32, #tpu.memory_space<vmem>>, vector<1x3x32xf32>
    "tpu.trace_start"() <{level = 10 : i32, message = "btn,bnd->btd"}> : () -> ()
    %cst = arith.constant dense<0.000000e+00> : vector<1x3x32xf32>
    %6 = tpu.matmul %3, %4, %cst {dimension_numbers = #tpu.dot_dimension_numbers<[2], [1], [1], [2], [0, 0, 0, 1, 1, 2], [0], [0]>} : vector<1x3x16xbf16>, vector<1x16x32xbf16>, vector<1x3x32xf32> -> vector<1x3x32xf32>
    "tpu.trace_stop"() : () -> ()
    %7 = arith.addf %5, %6 : vector<1x3x32xf32>
    %c0_9 = arith.constant 0 : index
    %c0_10 = arith.constant 0 : index
    %c0_11 = arith.constant 0 : index
    %8 = vector.load %arg8[%c0_9, %c0_10, %c0_11] : memref<1x3x32xf32, #tpu.memory_space<vmem>>, vector<1x3x32xf32>
    tpu.vector_store %arg8[%c0_9, %c0_10, %c0_11], %7 {strides = array<i32>} : memref<1x3x32xf32, #tpu.memory_space<vmem>>, vector<1x3x32xf32>,
    %c0_12 = arith.constant 0 : index
    %c0_13 = arith.constant 0 : index
    %c0_14 = arith.constant 0 : index
    %9 = vector.load %arg9[%c0_12, %c0_13, %c0_14] : memref<1x3x1xf32, #tpu.memory_space<vmem>>, vector<1x3x1xf32>
    %10 = arith.extf %3 : vector<1x3x16xbf16> to vector<1x3x16xf32>
    %cst_15 = arith.constant dense<0.000000e+00> : vector<1x3xf32>
    %11 = vector.multi_reduction <add>, %10, %cst_15 [2] : vector<1x3x16xf32> to vector<1x3xf32>
    %12 = vector.shape_cast %11 : vector<1x3xf32> to vector<1x3x1xf32>
    %13 = arith.addf %9, %12 : vector<1x3x1xf32>
    %c0_16 = arith.constant 0 : index
    %c0_17 = arith.constant 0 : index
    %c0_18 = arith.constant 0 : index
    %14 = vector.load %arg9[%c0_16, %c0_17, %c0_18] : memref<1x3x1xf32, #tpu.memory_space<vmem>>, vector<1x3x1xf32>
    tpu.vector_store %arg9[%c0_16, %c0_17, %c0_18], %13 {strides = array<i32>} : memref<1x3x1xf32, #tpu.memory_space<vmem>>, vector<1x3x1xf32>,
    %c0_i32_19 = arith.constant 0 : i32
    %15 = arith.cmpi eq, %arg1, %c0_i32_19 : i32
    %16 = arith.extui %15 : i1 to i32
    %c0_i32_20 = arith.constant 0 : i32
    %17 = arith.cmpi ne, %16, %c0_i32_20 : i32
    scf.if %17 {
      %c0_21 = arith.constant 0 : index
      %c0_22 = arith.constant 0 : index
      %c0_23 = arith.constant 0 : index
      %18 = vector.load %arg8[%c0_21, %c0_22, %c0_23] : memref<1x3x32xf32, #tpu.memory_space<vmem>>, vector<1x3x32xf32>
      %c0_24 = arith.constant 0 : index
      %c0_25 = arith.constant 0 : index
      %c0_26 = arith.constant 0 : index
      %19 = vector.load %arg9[%c0_24, %c0_25, %c0_26] : memref<1x3x1xf32, #tpu.memory_space<vmem>>, vector<1x3x1xf32>
      %cst_27 = arith.constant 9.99999993E-9 : f32
      %20 = vector.broadcast %cst_27 : f32 to vector<1x3x1xf32>
      %21 = arith.addf %19, %20 : vector<1x3x1xf32>
      %22 = vector.broadcast %21 : vector<1x3x1xf32> to vector<1x3x32xf32>
      %23 = arith.divf %18, %22 : vector<1x3x32xf32>
      %c0_28 = arith.constant 0 : index
      %c0_29 = arith.constant 0 : index
      %24 = vector.load %arg6[%c0_28, %c0_29] : memref<3x32xf32, #tpu.memory_space<vmem>>, vector<3x32xf32>
      %25 = vector.extract_strided_slice %23 {offsets = [0, 0, 0], sizes = [1, 1, 32], strides = [1, 1, 1]} : vector<1x3x32xf32> to vector<1x1x32xf32>
      %26 = vector.shape_cast %25 : vector<1x1x32xf32> to vector<1x32xf32>
      %c0_30 = arith.constant 0 : index
      %c0_31 = arith.constant 0 : index
      %c0_32 = arith.constant 0 : index
      %27 = vector.load %arg5[%c0_30, %c0_31, %c0_32] : memref<3x32x32xf32, #tpu.memory_space<vmem>>, vector<1x32x32xf32>
      %28 = vector.shape_cast %27 : vector<1x32x32xf32> to vector<32x32xf32>
      %cst_33 = arith.constant dense<0.000000e+00> : vector<1x32xf32>
      %29 = tpu.matmul %26, %28, %cst_33 {dimension_numbers = #tpu.dot_dimension_numbers<[1], [0], [0], [1], [0, 0, 1, 1], [], []>} : vector<1x32xf32>, vector<32x32xf32>, vector<1x32xf32> -> vector<1x32xf32>
      %30 = vector.extract_strided_slice %24 {offsets = [0, 0], sizes = [1, 32], strides = [1, 1]} : vector<3x32xf32> to vector<1x32xf32>
      %31 = arith.addf %29, %30 : vector<1x32xf32>
      %32 = math.tanh %31 : vector<1x32xf32>
      %33 = vector.extract_strided_slice %23 {offsets = [0, 1, 0], sizes = [1, 1, 32], strides = [1, 1, 1]} : vector<1x3x32xf32> to vector<1x1x32xf32>
      %34 = vector.shape_cast %33 : vector<1x1x32xf32> to vector<1x32xf32>
      %c1 = arith.constant 1 : index
      %c0_34 = arith.constant 0 : index
      %c0_35 = arith.constant 0 : index
      %35 = vector.load %arg5[%c1, %c0_34, %c0_35] : memref<3x32x32xf32, #tpu.memory_space<vmem>>, vector<1x32x32xf32>
      %36 = vector.shape_cast %35 : vector<1x32x32xf32> to vector<32x32xf32>
      %cst_36 = arith.constant dense<0.000000e+00> : vector<1x32xf32>
      %37 = tpu.matmul %34, %36, %cst_36 {dimension_numbers = #tpu.dot_dimension_numbers<[1], [0], [0], [1], [0, 0, 1, 1], [], []>} : vector<1x32xf32>, vector<32x32xf32>, vector<1x32xf32> -> vector<1x32xf32>
      %38 = vector.extract_strided_slice %24 {offsets = [1, 0], sizes = [1, 32], strides = [1, 1]} : vector<3x32xf32> to vector<1x32xf32>
      %39 = arith.addf %37, %38 : vector<1x32xf32>
      %40 = math.tanh %39 : vector<1x32xf32>
      %41 = vector.extract_strided_slice %23 {offsets = [0, 2, 0], sizes = [1, 1, 32], strides = [1, 1, 1]} : vector<1x3x32xf32> to vector<1x1x32xf32>
      %42 = vector.shape_cast %41 : vector<1x1x32xf32> to vector<1x32xf32>
      %c2 = arith.constant 2 : index
      %c0_37 = arith.constant 0 : index
      %c0_38 = arith.constant 0 : index
      %43 = vector.load %arg5[%c2, %c0_37, %c0_38] : memref<3x32x32xf32, #tpu.memory_space<vmem>>, vector<1x32x32xf32>
      %44 = vector.shape_cast %43 : vector<1x32x32xf32> to vector<32x32xf32>
      %cst_39 = arith.constant dense<0.000000e+00> : vector<1x32xf32>
      %45 = tpu.matmul %42, %44, %cst_39 {dimension_numbers = #tpu.dot_dimension_numbers<[1], [0], [0], [1], [0, 0, 1, 1], [], []>} : vector<1x32xf32>, vector<32x32xf32>, vector<1x32xf32> -> vector<1x32xf32>
      %46 = vector.extract_strided_slice %24 {offsets = [2, 0], sizes = [1, 32], strides = [1, 1]} : vector<3x32xf32> to vector<1x32xf32>
      %47 = arith.addf %45, %46 : vector<1x32xf32>
      %48 = math.tanh %47 : vector<1x32xf32>
      %c0_40 = arith.constant 0 : index
      %c0_41 = arith.constant 0 : index
      %c0_42 = arith.constant 0 : index
      %49 = vector.load %arg4[%c0_40, %c0_41, %c0_42] : memref<1x6x32xf32, #tpu.memory_space<vmem>>, vector<1x6x32xf32>
      %50 = vector.extract_strided_slice %49 {offsets = [0, 0, 0], sizes = [1, 1, 32], strides = [1, 1, 1]} : vector<1x6x32xf32> to vector<1x1x32xf32>
      %51 = vector.shape_cast %50 : vector<1x1x32xf32> to vector<1x32xf32>
      %52 = vector.extract_strided_slice %49 {offsets = [0, 1, 0], sizes = [1, 1, 32], strides = [1, 1, 1]} : vector<1x6x32xf32> to vector<1x1x32xf32>
      %53 = vector.shape_cast %52 : vector<1x1x32xf32> to vector<1x32xf32>
      %54 = vector.extract_strided_slice %49 {offsets = [0, 2, 0], sizes = [1, 1, 32], strides = [1, 1, 1]} : vector<1x6x32xf32> to vector<1x1x32xf32>
      %55 = vector.shape_cast %54 : vector<1x1x32xf32> to vector<1x32xf32>
      %56 = vector.extract_strided_slice %49 {offsets = [0, 3, 0], sizes = [1, 1, 32], strides = [1, 1, 1]} : vector<1x6x32xf32> to vector<1x1x32xf32>
      %57 = vector.shape_cast %56 : vector<1x1x32xf32> to vector<1x32xf32>
      %58 = vector.extract_strided_slice %49 {offsets = [0, 4, 0], sizes = [1, 1, 32], strides = [1, 1, 1]} : vector<1x6x32xf32> to vector<1x1x32xf32>
      %59 = vector.shape_cast %58 : vector<1x1x32xf32> to vector<1x32xf32>
      %60 = vector.extract_strided_slice %49 {offsets = [0, 5, 0], sizes = [1, 1, 32], strides = [1, 1, 1]} : vector<1x6x32xf32> to vector<1x1x32xf32>
      %61 = vector.shape_cast %60 : vector<1x1x32xf32> to vector<1x32xf32>
      %62 = arith.addf %51, %53 : vector<1x32xf32>
      %63 = arith.subf %62, %55 : vector<1x32xf32>
      %cst_43 = arith.constant 9.99999997E-7 : f32
      %64 = vector.broadcast %cst_43 : f32 to vector<1x32xf32>
      %65 = arith.addf %63, %64 : vector<1x32xf32>
      %66 = arith.addf %57, %59 : vector<1x32xf32>
      %67 = arith.subf %66, %61 : vector<1x32xf32>
      %cst_44 = arith.constant 9.99999997E-7 : f32
      %68 = vector.broadcast %cst_44 : f32 to vector<1x32xf32>
      %69 = arith.addf %67, %68 : vector<1x32xf32>
      %70 = arith.mulf %65, %65 : vector<1x32xf32>
      %cst_45 = arith.constant dense<0.000000e+00> : vector<1xf32>
      %71 = vector.multi_reduction <add>, %70, %cst_45 [1] : vector<1x32xf32> to vector<1xf32>
      %72 = vector.shape_cast %71 : vector<1xf32> to vector<1x1xf32>
      %73 = math.sqrt %72 : vector<1x1xf32>
      %74 = arith.mulf %69, %69 : vector<1x32xf32>
      %cst_46 = arith.constant dense<0.000000e+00> : vector<1xf32>
      %75 = vector.multi_reduction <add>, %74, %cst_46 [1] : vector<1x32xf32> to vector<1xf32>
      %76 = vector.shape_cast %75 : vector<1xf32> to vector<1x1xf32>
      %77 = math.sqrt %76 : vector<1x1xf32>
      %78 = arith.subf %73, %77 : vector<1x1xf32>
      %cst_47 = arith.constant 1.000000e+00 : f32
      %79 = vector.broadcast %cst_47 : f32 to vector<1x1xf32>
      %80 = arith.addf %78, %79 : vector<1x1xf32>
      %cst_48 = arith.constant 0.000000e+00 : f32
      %81 = vector.broadcast %cst_48 : f32 to vector<1x1xf32>
      %82 = arith.maximumf %80, %81 : vector<1x1xf32>
      %83 = arith.subf %51, %40 : vector<1x32xf32>
      %84 = arith.mulf %83, %83 : vector<1x32xf32>
      %cst_49 = arith.constant dense<0.000000e+00> : vector<1xf32>
      %85 = vector.multi_reduction <add>, %84, %cst_49 [1] : vector<1x32xf32> to vector<1xf32>
      %86 = vector.shape_cast %85 : vector<1xf32> to vector<1x1xf32>
      %87 = arith.subf %55, %48 : vector<1x32xf32>
      %88 = arith.mulf %87, %87 : vector<1x32xf32>
      %cst_50 = arith.constant dense<0.000000e+00> : vector<1xf32>
      %89 = vector.multi_reduction <add>, %88, %cst_50 [1] : vector<1x32xf32> to vector<1xf32>
      %90 = vector.shape_cast %89 : vector<1xf32> to vector<1x1xf32>
      %91 = arith.addf %86, %90 : vector<1x1xf32>
      %92 = arith.subf %53, %32 : vector<1x32xf32>
      %93 = arith.mulf %92, %92 : vector<1x32xf32>
      %cst_51 = arith.constant dense<0.000000e+00> : vector<1xf32>
      %94 = vector.multi_reduction <add>, %93, %cst_51 [1] : vector<1x32xf32> to vector<1xf32>
      %95 = vector.shape_cast %94 : vector<1xf32> to vector<1x1xf32>
      %96 = arith.addf %91, %95 : vector<1x1xf32>
      %cst_52 = arith.constant 2.000000e+00 : f32
      %97 = vector.broadcast %cst_52 : f32 to vector<1x1xf32>
      %98 = arith.divf %82, %97 : vector<1x1xf32>
      %cst_53 = arith.constant 0.00999999977 : f32
      %99 = vector.broadcast %cst_53 : f32 to vector<1x1xf32>
      %100 = arith.mulf %99, %96 : vector<1x1xf32>
      %cst_54 = arith.constant 1.280000e+02 : f32
      %101 = vector.broadcast %cst_54 : f32 to vector<1x1xf32>
      %102 = arith.divf %100, %101 : vector<1x1xf32>
      %103 = arith.addf %98, %102 : vector<1x1xf32>
      %104 = vector.shape_cast %103 : vector<1x1xf32> to vector<1x1x1xf32>
      %105 = vector.shape_cast %104 : vector<1x1x1xf32> to vector<1x1x1xf32>
      %106 = vector.broadcast %105 : vector<1x1x1xf32> to vector<1x1x128xf32>
      %c0_55 = arith.constant 0 : index
      %c0_56 = arith.constant 0 : index
      %c0_57 = arith.constant 0 : index
      %107 = vector.load %arg7[%c0_55, %c0_56, %c0_57] : memref<1x1x128xf32, #tpu.memory_space<vmem>>, vector<1x1x128xf32>
      tpu.vector_store %arg7[%c0_55, %c0_56, %c0_57], %106 {strides = array<i32>} : memref<1x1x128xf32, #tpu.memory_space<vmem>>, vector<1x1x128xf32>,
    } else {
    }
    return
  }
  func.func @transform_0(%arg0: i32, %arg1: i32) -> (i32, i32, i32) {
    %c0_i32 = arith.constant 0 : i32
    %c0_i32_0 = arith.constant 0 : i32
    return %arg0, %arg1, %c0_i32 : i32, i32, i32
  }
  func.func @transform_1(%arg0: i32, %arg1: i32) -> (i32, i32, i32) {
    %c0_i32 = arith.constant 0 : i32
    %c0_i32_0 = arith.constant 0 : i32
    return %arg0, %c0_i32, %arg1 : i32, i32, i32
  }
  func.func @transform_2(%arg0: i32, %arg1: i32) -> (i32, i32, i32) {
    %c0_i32 = arith.constant 0 : i32
    %c0_i32_0 = arith.constant 0 : i32
    %c0_i32_1 = arith.constant 0 : i32
    return %arg0, %c0_i32, %c0_i32_0 : i32, i32, i32
  }
  func.func @transform_3(%arg0: i32, %arg1: i32) -> (i32, i32, i32) {
    %c0_i32 = arith.constant 0 : i32
    %c0_i32_0 = arith.constant 0 : i32
    %c0_i32_1 = arith.constant 0 : i32
    %c0_i32_2 = arith.constant 0 : i32
    return %c0_i32, %c0_i32_0, %c0_i32_1 : i32, i32, i32
  }
  func.func @transform_4(%arg0: i32, %arg1: i32) -> (i32, i32) {
    %c0_i32 = arith.constant 0 : i32
    %c0_i32_0 = arith.constant 0 : i32
    %c0_i32_1 = arith.constant 0 : i32
    return %c0_i32, %c0_i32_0 : i32, i32
  }
  func.func @transform_5(%arg0: i32, %arg1: i32) -> (i32, i32, i32) {
    %c0_i32 = arith.constant 0 : i32
    %c0_i32_0 = arith.constant 0 : i32
    %c0_i32_1 = arith.constant 0 : i32
    return %arg0, %c0_i32, %c0_i32_0 : i32, i32, i32
  }
}

</mosaic_0001>

<bundles_post_ra>
// kernel: transtext_forward.1
= control target key start
LH: loop header
LB: loop body
LE: loop exit
PB: predicated region body
PF: predicated region fallthrough
CT: control target
= control target key end

     0   :  { %s974_s18 = smov 0   ;;  %s976_s19 = smov 0   ;;  %s1101_s0 = inlined_call_operand.vmem [shape: bf16[2,16,32], index: 0, kind: input, shape index: {}]   ;;  %s1102_s1 = inlined_call_operand.vmem [shape: bf16[2,3,16], index: 1, kind: input, shape index: {}]   ;;  %s1103_s2 = inlined_call_operand.vmem [shape: f32[2,6,32], index: 2, kind: input, shape index: {}]   ;;  %s1104_s3 = inlined_call_operand.vmem [shape: f32[3,32,32], index: 3, kind: input, shape index: {}]   ;;  %s1105_s4 = inlined_call_operand.vmem [shape: f32[3,32], index: 4, kind: input, shape index: {}]   ;;  %s1106_s5 = inlined_call_operand.vmem [shape: f32[2,1,128], index: 5, kind: output, shape index: {}]  }
   0x1   :  { %s978_s20 = smov 0  }
   0x2 LB: > { %s27_s21 = sadd.s32 1, %s935_s19  ;;  %p798_p0 = scmp.ge.s32.totalorder %s939_s20, 1  ;;  %s939_s20 = sphi %s978_s20, %s15_s20   ;;  %s935_s19 = sphi %s976_s19, %s1108_s19   ;;  %s931_s18 = sphi %s974_s18, %s1107_s18  }
   0x3   : > { %p29_p1 = scmp.ge.s32.totalorder %s27_s21, 2  ;;  %p229_p2 = scmp.lt.s32.totalorder %s939_s20, 3 }
   0x5   : > { %s1110_s21 = smov (%p29_p1, %s27_s21), 0  ;;  %p230_p3 = pnand %p798_p0, %p229_p2 }
   0x6   : > { %p271_p4 = scmp.lt.s32.totalorder (!%p230_p3), %s931_s18, 1 }
   0x7   : > { %233 = sbr.rel (%p230_p3) target bundleno = 810 (0x32a), region = 40 }
   0xc   : > { %v941_v0 = vmov 0.0   ;;  %vm942_vm0 = vmmov 0   ;;  %vm301_vm1 = vcmask 2048   ;;  %s1112_s18 = smov (!%p271_p4, %s931_s18), 1  ;;  %vm362_vm2 = vcmask 124928   ;;  %v386_v9 = vld [vmem:[%s1104_s3 + $0x18] sm:$0xff] }
   0xd   : > { %836 = vmatprep.subr.bf16.mxu0 %v941_v0  ;;  %838 = vmatprep.mubr.msk.bf16.mxu0 %vm942_vm0, %v941_v0  ;;  %302 = vst.msk [vmem:[#allocation3] sm:$0x7] %vm301_vm1, %v941_v0  ;;  %s801_s22 = sshll.u32 %s1112_s18, 1  ;;  %s818_s23 = sshll.u32 %s1112_s18, 3  ;;  %vm313_vm3 = vcmask 130048   ;;  %v943_v5 = vmov 0  }
   0xe   : > { %842 = vmatprep.subr.mxu1 %v941_v0  ;;  %850 = vmatprep.mubr.msk.f32.mxu1 %vm942_vm0, %v941_v0  ;;  %s286_s26 = scalar_lea.vmem %s1102_s1, %s801_s22  ;;  %s278_s29 = scalar_lea.vmem %s1101_s0, %s818_s23  ;;  %vm299_vm4 = vcmask 256000   ;;  %v385_v10 = vld [vmem:[%s1104_s3 + $0x10] sm:$0xff]  ;;  %v809_v11 = vld [vmem:[%s1104_s3 + $0x38] sm:$0xff]  ;;  %v384_v15 = vld [vmem:[%s1104_s3 + $0x8] sm:$0xff]  ;;  %vm646_vm5 = vcmask 257027   ;;  %vm635_vm6 = vcmask 253952  }
   0xf   : > { %v303_v1 = vld [vmem:[%s286_s26] sm:$0x3]  ;;  %902 = vset.pattern.permute.xlu0 %v943_v5  ;;  %903 = vset.pattern.permute.xlu1 %v943_v5  ;;  %300 = vst.msk [vmem:[#allocation2] sm:$0x7] %vm299_vm4, %v941_v0  ;;  %v808_v13 = vld [vmem:[%s1104_s3 + $0x30] sm:$0xff]  ;;  %v807_v16 = vld [vmem:[%s1104_s3 + $0x28] sm:$0xff]  ;;  %s290_s28 = scalar_lea.vmem %s1103_s2, %s818_s23  ;;  %s293_s15 = scalar_lea.vmem %s1106_s5, %s1112_s18 }
  0x10   : > { %v361_v2 = vunpack.c.l.bf16 %v303_v1  ;;  %v904_v3 = vld [vmem:[%s278_s29] sm:$0xff]   ;;  %843 = vmatpush3.msra.mxu1 %v386_v9  ;;  %vm387_vm7 = vcmask 261120   ;;  %v814_v38 = vld [vmem:[%s1104_s3 + $0x58] sm:$0xff]  ;;  %v813_v40 = vld [vmem:[%s1104_s3 + $0x50] sm:$0xff]  ;;  %vm673_vm8 = vcmask 256002   ;;  %vm686_vm9 = vcmask 254977  }
  0x11   : > { %837 = vmatpush3.bf16.msra.mxu0 %v904_v3  ;;  %844 = vmatprep.subr.mxu1 %v941_v0  ;;  %v383_v17 = vld [vmem:[%s1104_s3] sm:$0xff]  ;;  %v812_v41 = vld [vmem:[%s1104_s3 + $0x48] sm:$0xff] }
  0x12   : > { %v363_v4 = vsel %vm362_vm2, %v361_v2, 0.0  ;;  %853 = vmatprep.subr.mxu0 %v941_v0  ;;  %845 = vmatpush3.msra.mxu1 %v385_v10  ;;  %v806_v18 = vld [vmem:[%s1104_s3 + $0x20] sm:$0xff] }
  0x13   : > { %364 = vadd.xlane.f32.xlu0 %v363_v4  ;;  %846 = vmatprep.subr.mxu1 %v941_v0  ;;  %v1054_v19 = vld [vmem:[%s290_s28] sm:$0x3f] }
  0x14   : > { %839 = vmatmul.mubr.msk.bf16.vlgmr.msra.gmra.mxu0 %vm313_vm3, %v303_v1  ;;  %v360_v6 = vld [vmem:[#allocation3] sm:$0x7]  ;;  %847 = vmatpush3.msra.mxu1 %v384_v15  ;;  %v627_v20 = vrot.slane %v1054_v19, 1  ;;  %v630_v21 = vrot.slane %v1054_v19, 2  ;;  %v382_v44 = vld [vmem:[%s1105_s4] sm:$0x7] }
  0x15   : > { %861 = vmatprep.mubr.msk.f32.mxu0 %vm942_vm0, %v941_v0  ;;  %854 = vmatpush3.msra.mxu0 %v809_v11  ;;  %v811_v42 = vld [vmem:[%s1104_s3 + $0x40] sm:$0xff]  ;;  %v469_v45 = vrot.slane %v382_v44, 1  ;;  %v550_v52 = vrot.slane %v382_v44, 2 }
  0x16   : > { %855 = vmatprep.subr.mxu0 %v941_v0  ;;  %848 = vmatprep.subr.mxu1 %v941_v0  ;;  %v629_v22 = vadd.f32 %v627_v20, %v1054_v19  ;;  %v306_v28 = vld [vmem:[#allocation2] sm:$0x7] }
  0x17   : > { %856 = vmatpush3.msra.mxu0 %v808_v13  ;;  %849 = vmatpush3.msra.mxu1 %v383_v17 }
  0x18   : > { %857 = vmatprep.subr.mxu0 %v941_v0  ;;  %864 = vmatprep.subr.mxu1 %v941_v0  ;;  %v632_v23 = vsub.f32 %v629_v22, %v630_v21 }
  0x19   : > { %858 = vmatpush3.msra.mxu0 %v807_v16 }
  0x1a   : > { %859 = vmatprep.subr.mxu0 %v941_v0  ;;  %v633_v24 = vadd.f32 1e-06, %v632_v23 }
  0x1b   : > { %860 = vmatpush3.msra.mxu0 %v806_v18 }
  0x1c   : > { %v634_v25 = vmul.f32 %v633_v24, %v633_v24 }
  0x1e   : > { %v647_v26 = vsel %vm646_vm5, %v634_v25, 0.0  ;;  %v636_v27 = vsel %vm635_vm6, %v634_v25, 0.0 }
  0x1f   : > { %648 = vadd.xlane.f32.xlu1 %v647_v26 }
  0x23   : > { %637 = vadd.xlane.f32.xlu1 %v636_v27 }
  0x9c   : > { %v365_v7 = vpop.xlane.xlu0 %364 }
  0x9d   : > { %v366_v8 = vadd.f32 %v365_v7, %v360_v6 }
  0x9f   : > { %368 = vst.msk [vmem:[#allocation3] sm:$0x7] %vm301_vm1, %v366_v8 }
  0xa6   : > { %v373_v12 = vld [vmem:[#allocation3] sm:$0x7] }
  0xa7   : > { %v374_v14 = vadd.f32 1e-08, %v373_v12 }
  0xa8   : > { %v649_v6 = vpop.xlane.xlu1 %648 }
  0xa9   : > { %377 = vperm.xlu0 %902, %v374_v14   ;;  %vm652_vm10 = vcmp.eq.f32.partialorder %v649_v6, inf  ;;  %v655_v11 = vand.u32 2147483648, %v649_v6  ;;  %vm654_vm11 = vcmp.eq.f32.partialorder %v649_v6, 0.0 }
  0xac   : > { %v638_v7 = vpop.xlane.xlu1 %637 }
  0xad   : > { %vm641_vm12 = vcmp.eq.f32.partialorder %v638_v7, inf  ;;  %v644_v14 = vand.u32 2147483648, %v638_v7  ;;  %vm643_vm13 = vcmp.eq.f32.partialorder %v638_v7, 0.0 }
  0xd4   : > { %v351_v29 = vpop.f32.mrf.mxu0 }
  0xd5   : > { %v357_v30 = vadd.f32 %v351_v29, %v306_v28 }
  0xd6   : > { %v840_v31 = vpop.f32.mrf.mxu0 }
  0xd7   : > { %359 = vst.msk [vmem:[#allocation2] sm:$0x7] %vm299_vm4, %v357_v30 }
  0xd8   : > { %v354_v32 = vpop.f32.mrf.mxu0 }
  0xda   : > { %v841_v33 = vpop.f32.mrf.mxu0 }
  0xde   : > { %v372_v35 = vld [vmem:[#allocation2] sm:$0x7] }
 0x124   : > { %v378_v34 = vpop.permute.xlu0 %377 }
 0x125   : > { %905 = vrcp.f32 %v378_v34 }
 0x132   : > { %v906_v36 = vpop.eup %905 }
 0x133   : > { %v381_v37 = vmul.f32 %v906_v36, %v372_v35 }
 0x135   : > { %851 = vmatmul.mubr.msk.f32.vlgmr.msra.gmra.mxu1 %vm387_vm7, %v381_v37  ;;  %v467_v39 = vrot.slane %v381_v37, 1  ;;  %v549_v43 = vrot.slane %v381_v37, 2 }
 0x136   : > { %865 = vmatpush3.msra.mxu1 %v814_v38  ;;  %872 = vmatprep.mubr.msk.f32.mxu1 %vm942_vm0, %v941_v0 }
 0x137   : > { %866 = vmatprep.subr.mxu1 %v941_v0  ;;  %862 = vmatmul.mubr.msk.f32.vlgmr.msra.gmra.mxu0 %vm387_vm7, %v467_v39 }
 0x138   : > { %867 = vmatpush3.msra.mxu1 %v813_v40 }
 0x139   : > { %868 = vmatprep.subr.mxu1 %v941_v0 }
 0x13a   : > { %869 = vmatpush3.msra.mxu1 %v812_v41 }
 0x13b   : > { %870 = vmatprep.subr.mxu1 %v941_v0 }
 0x13c   : > { %871 = vmatpush3.msra.mxu1 %v811_v42 }
 0x13d   : > { %873 = vmatmul.mubr.msk.f32.vlgmr.msra.gmra.mxu1 %vm387_vm7, %v549_v43 }
 0x1f5   : > { %v457_v46 = vpop.f32.mrf.mxu1 }
 0x1f6   : > { %v458_v49 = vadd.f32 %v457_v46, %v382_v44 }
 0x1f7   : > { %v852_v47 = vpop.f32.mrf.mxu1  ;;  %v539_v48 = vpop.f32.mrf.mxu0 }
 0x1f8   : > { %v540_v50 = vadd.f32 %v539_v48, %v469_v45 }
 0x1f9   : > { %v863_v51 = vpop.f32.mrf.mxu0 }
 0x1fa   : > { %907 = vtanh.f32 %v540_v50 }
 0x1fb   : > { %909 = vtanh.f32 %v458_v49 }
 0x1fd   : > { %v620_v53 = vpop.f32.mrf.mxu1 }
 0x1fe   : > { %v621_v54 = vadd.f32 %v620_v53, %v550_v52 }
 0x1ff   : > { %v874_v55 = vpop.f32.mrf.mxu1 }
 0x200   : > { %911 = vtanh.f32 %v621_v54 }
 0x201   : > { %913 = vrsqrt.f32 %v649_v6 }
 0x202   : > { %915 = vrsqrt.f32 %v638_v7 }
 0x207   : > { %v908_v56 = vpop.eup %907 }
 0x208   : > { %v663_v57 = vsub.f32 %v1054_v19, %v908_v56  ;;  %v910_v58 = vpop.eup %909 }
 0x209   : > { %v682_v60 = vrot.slane %v910_v58, 7 }
 0x20a   : > { %v664_v59 = vmul.f32 %v663_v57, %v663_v57 }
 0x20b   : > { %v684_v1 = vsub.f32 %v1054_v19, %v682_v60 }
 0x20c   : > { %v665_v61 = vsel %vm635_vm6, %v664_v59, 0.0 }
 0x20d   : > { %v912_v62 = vpop.eup %911  ;;  %666 = vadd.xlane.f32.xlu1 %v665_v61  ;;  %v685_v4 = vmul.f32 %v684_v1, %v684_v1 }
 0x20e   : > { %v669_v63 = vrot.slane %v912_v62, 6  ;;  %v914_v8 = vpop.eup %913 }
 0x20f   : > { %v687_v5 = vsel %vm686_vm9, %v685_v4, 0.0  ;;  %v651_v9 = vmul.f32 %v914_v8, %v649_v6  ;;  %v916_v10 = vpop.eup %915 }
 0x210   : > { %v671_v0 = vsub.f32 %v1054_v19, %v669_v63  ;;  %v640_v13 = vmul.f32 %v916_v10, %v638_v7 }
 0x211   : > { %v653_v12 = vsel %vm652_vm10, %v649_v6, %v651_v9 }
 0x212   : > { %v672_v2 = vmul.f32 %v671_v0, %v671_v0  ;;  %v656_v15 = vsel %vm654_vm11, %v655_v11, %v653_v12  ;;  %v642_v16 = vsel %vm641_vm12, %v638_v7, %v640_v13 }
 0x213   : > { %v658_v17 = vrot.slane %v656_v15, 3  ;;  %v645_v19 = vsel %vm643_vm13, %v644_v14, %v642_v16 }
 0x214   : > { %v674_v3 = vsel %vm673_vm8, %v672_v2, 0.0 }
 0x215   : > { %675 = vadd.xlane.f32.xlu1 %v674_v3  ;;  %v660_v20 = vsub.f32 %v645_v19, %v658_v17 }
 0x217   : > { %v661_v23 = vadd.f32 1.0, %v660_v20 }
 0x219   : > { %688 = vadd.xlane.f32.xlu1 %v687_v5  ;;  %v662_v28 = vmax.f32 %v661_v23, 0.0 }
 0x21b   : > { %v695_v31 = vmul.f32 0.5, %v662_v28 }
 0x296   : > { %v667_v18 = vpop.xlane.xlu1 %666 }
 0x29e   : > { %v676_v21 = vpop.xlane.xlu1 %675 }
 0x29f   : > { %v678_v22 = vrot.slane %v676_v21, 2 }
 0x2a1   : > { %v680_v25 = vadd.f32 %v678_v22, %v667_v18 }
 0x2a2   : > { %v689_v24 = vpop.xlane.xlu1 %688 }
 0x2a3   : > { %v691_v26 = vrot.slane %v689_v24, 1 }
 0x2a5   : > { %v693_v27 = vadd.f32 %v691_v26, %v680_v25 }
 0x2a7   : > { %v696_v29 = vmul.f32 0.01, %v693_v27 }
 0x2a9   : > { %v698_v30 = vmul.f32 0.0078125, %v696_v29 }
 0x2ab   : > { %v699_v32 = vadd.f32 %v698_v30, %v695_v31 }
 0x2ad   : > { %702 = vperm.xlu1 %903, %v699_v32  }
 0x328   : > { %v703_v33 = vpop.permute.xlu1 %702 }
 0x329   : > { %705 = vst [vmem:[%s293_s15] sm:$0x1] %v703_v33 }
 0x32a PF: > { %s15_s20 = sadd.s32 1, %s939_s20   ;;  %s1107_s18 = smov %s935_s19 }
 0x32b   : > { %p12_p5 = scmp.ge.s32.totalorder %s15_s20, 4   ;;  %s1108_s19 = smov %s1110_s21 }
 0x32d   :  { %14 = sbr.rel (!%p12_p5) target bundleno = 2 (0x2), region = 86 }

// kernel: transtext_forward.1
= control target key start
LH: loop header
LB: loop body
LE: loop exit
PB: predicated region body
PF: predicated region fallthrough
CT: control target
= control target key end

     0   :  { %s974_s18 = smov 0   ;;  %s976_s19 = smov 0   ;;  %s1101_s0 = inlined_call_operand.vmem [shape: bf16[2,16,32], index: 0, kind: input, shape index: {}]   ;;  %s1102_s1 = inlined_call_operand.vmem [shape: bf16[2,3,16], index: 1, kind: input, shape index: {}]   ;;  %s1103_s2 = inlined_call_operand.vmem [shape: f32[2,6,32], index: 2, kind: input, shape index: {}]   ;;  %s1104_s3 = inlined_call_operand.vmem [shape: f32[3,32,32], index: 3, kind: input, shape index: {}]   ;;  %s1105_s4 = inlined_call_operand.vmem [shape: f32[3,32], index: 4, kind: input, shape index: {}]   ;;  %s1106_s5 = inlined_call_operand.vmem [shape: f32[2,1,128], index: 5, kind: output, shape index: {}]  }
   0x1   :  { %s978_s20 = smov 0  }
   0x2 LB: > { %s27_s21 = sadd.s32 1, %s935_s19  ;;  %p798_p0 = scmp.ge.s32.totalorder %s939_s20, 1  ;;  %s939_s20 = sphi %s978_s20, %s15_s20   ;;  %s935_s19 = sphi %s976_s19, %s1108_s19   ;;  %s931_s18 = sphi %s974_s18, %s1107_s18  }
   0x3   : > { %p29_p1 = scmp.ge.s32.totalorder %s27_s21, 2  ;;  %p229_p2 = scmp.lt.s32.totalorder %s939_s20, 3 }
   0x5   : > { %s1110_s21 = smov (%p29_p1, %s27_s21), 0  ;;  %p230_p3 = pnand %p798_p0, %p229_p2 }
   0x6   : > { %p271_p4 = scmp.lt.s32.totalorder (!%p230_p3), %s931_s18, 1 }
   0x7   : > { %233 = sbr.rel (%p230_p3) target bundleno = 810 (0x32a), region = 40 }
   0xc   : > { %v941_v0 = vmov 0.0   ;;  %vm942_vm0 = vmmov 0   ;;  %vm301_vm1 = vcmask 2048   ;;  %s1112_s18 = smov (!%p271_p4, %s931_s18), 1  ;;  %vm362_vm2 = vcmask 124928   ;;  %v386_v9 = vld [vmem:[%s1104_s3 + $0x18] sm:$0xff] }
   0xd   : > { %836 = vmatprep.subr.bf16.mxu0 %v941_v0  ;;  %838 = vmatprep.mubr.msk.bf16.mxu0 %vm942_vm0, %v941_v0  ;;  %302 = vst.msk [vmem:[#allocation3] sm:$0x7] %vm301_vm1, %v941_v0  ;;  %s801_s22 = sshll.u32 %s1112_s18, 1  ;;  %s818_s23 = sshll.u32 %s1112_s18, 3  ;;  %vm313_vm3 = vcmask 130048   ;;  %v943_v5 = vmov 0  }
   0xe   : > { %842 = vmatprep.subr.mxu1 %v941_v0  ;;  %850 = vmatprep.mubr.msk.f32.mxu1 %vm942_vm0, %v941_v0  ;;  %s286_s26 = scalar_lea.vmem %s1102_s1, %s801_s22  ;;  %s278_s29 = scalar_lea.vmem %s1101_s0, %s818_s23  ;;  %vm299_vm4 = vcmask 256000   ;;  %v385_v10 = vld [vmem:[%s1104_s3 + $0x10] sm:$0xff]  ;;  %v809_v11 = vld [vmem:[%s1104_s3 + $0x38] sm:$0xff]  ;;  %v384_v15 = vld [vmem:[%s1104_s3 + $0x8] sm:$0xff]  ;;  %vm646_vm5 = vcmask 257027   ;;  %vm635_vm6 = vcmask 253952  }
   0xf   : > { %v303_v1 = vld [vmem:[%s286_s26] sm:$0x3]  ;;  %902 = vset.pattern.permute.xlu0 %v943_v5  ;;  %903 = vset.pattern.permute.xlu1 %v943_v5  ;;  %300 = vst.msk [vmem:[#allocation2] sm:$0x7] %vm299_vm4, %v941_v0  ;;  %v808_v13 = vld [vmem:[%s1104_s3 + $0x30] sm:$0xff]  ;;  %v807_v16 = vld [vmem:[%s1104_s3 + $0x28] sm:$0xff]  ;;  %s290_s28 = scalar_lea.vmem %s1103_s2, %s818_s23  ;;  %s293_s15 = scalar_lea.vmem %s1106_s5, %s1112_s18 }
  0x10   : > { %v361_v2 = vunpack.c.l.bf16 %v303_v1  ;;  %v904_v3 = vld [vmem:[%s278_s29] sm:$0xff]   ;;  %843 = vmatpush3.msra.mxu1 %v386_v9  ;;  %vm387_vm7 = vcmask 261120   ;;  %v814_v38 = vld [vmem:[%s1104_s3 + $0x58] sm:$0xff]  ;;  %v813_v40 = vld [vmem:[%s1104_s3 + $0x50] sm:$0xff]  ;;  %vm673_vm8 = vcmask 256002   ;;  %vm686_vm9 = vcmask 254977  }
  0x11   : > { %837 = vmatpush3.bf16.msra.mxu0 %v904_v3  ;;  %844 = vmatprep.subr.mxu1 %v941_v0  ;;  %v383_v17 = vld [vmem:[%s1104_s3] sm:$0xff]  ;;  %v812_v41 = vld [vmem:[%s1104_s3 + $0x48] sm:$0xff] }
  0x12   : > { %v363_v4 = vsel %vm362_vm2, %v361_v2, 0.0  ;;  %853 = vmatprep.subr.mxu0 %v941_v0  ;;  %845 = vmatpush3.msra.mxu1 %v385_v10  ;;  %v806_v18 = vld [vmem:[%s1104_s3 + $0x20] sm:$0xff] }
  0x13   : > { %364 = vadd.xlane.f32.xlu0 %v363_v4  ;;  %846 = vmatprep.subr.mxu1 %v941_v0  ;;  %v1054_v19 = vld [vmem:[%s290_s28] sm:$0x3f] }
  0x14   : > { %839 = vmatmul.mubr.msk.bf16.vlgmr.msra.gmra.mxu0 %vm313_vm3, %v303_v1  ;;  %v360_v6 = vld [vmem:[#allocation3] sm:$0x7]  ;;  %847 = vmatpush3.msra.mxu1 %v384_v15  ;;  %v627_v20 = vrot.slane %v1054_v19, 1  ;;  %v630_v21 = vrot.slane %v1054_v19, 2  ;;  %v382_v44 = vld [vmem:[%s1105_s4] sm:$0x7] }
  0x15   : > { %861 = vmatprep.mubr.msk.f32.mxu0 %vm942_vm0, %v941_v0  ;;  %854 = vmatpush3.msra.mxu0 %v809_v11  ;;  %v811_v42 = vld [vmem:[%s1104_s3 + $0x40] sm:$0xff]  ;;  %v469_v45 = vrot.slane %v382_v44, 1  ;;  %v550_v52 = vrot.slane %v382_v44, 2 }
  0x16   : > { %855 = vmatprep.subr.mxu0 %v941_v0  ;;  %848 = vmatprep.subr.mxu1 %v941_v0  ;;  %v629_v22 = vadd.f32 %v627_v20, %v1054_v19  ;;  %v306_v28 = vld [vmem:[#allocation2] sm:$0x7] }
  0x17   : > { %856 = vmatpush3.msra.mxu0 %v808_v13  ;;  %849 = vmatpush3.msra.mxu1 %v383_v17 }
  0x18   : > { %857 = vmatprep.subr.mxu0 %v941_v0  ;;  %864 = vmatprep.subr.mxu1 %v941_v0  ;;  %v632_v23 = vsub.f32 %v629_v22, %v630_v21 }
  0x19   : > { %858 = vmatpush3.msra.mxu0 %v807_v16 }
  0x1a   : > { %859 = vmatprep.subr.mxu0 %v941_v0  ;;  %v633_v24 = vadd.f32 1e-06, %v632_v23 }
  0x1b   : > { %860 = vmatpush3.msra.mxu0 %v806_v18 }
  0x1c   : > { %v634_v25 = vmul.f32 %v633_v24, %v633_v24 }
  0x1e   : > { %v647_v26 = vsel %vm646_vm5, %v634_v25, 0.0  ;;  %v636_v27 = vsel %vm635_vm6, %v634_v25, 0.0 }
  0x1f   : > { %648 = vadd.xlane.f32.xlu1 %v647_v26 }
  0x23   : > { %637 = vadd.xlane.f32.xlu1 %v636_v27 }
  0x9c   : > { %v365_v7 = vpop.xlane.xlu0 %364 }
  0x9d   : > { %v366_v8 = vadd.f32 %v365_v7, %v360_v6 }
  0x9f   : > { %368 = vst.msk [vmem:[#allocation3] sm:$0x7] %vm301_vm1, %v366_v8 }
  0xa6   : > { %v373_v12 = vld [vmem:[#allocation3] sm:$0x7] }
  0xa7   : > { %v374_v14 = vadd.f32 1e-08, %v373_v12 }
  0xa8   : > { %v649_v6 = vpop.xlane.xlu1 %648 }
  0xa9   : > { %377 = vperm.xlu0 %902, %v374_v14   ;;  %vm652_vm10 = vcmp.eq.f32.partialorder %v649_v6, inf  ;;  %v655_v11 = vand.u32 2147483648, %v649_v6  ;;  %vm654_vm11 = vcmp.eq.f32.partialorder %v649_v6, 0.0 }
  0xac   : > { %v638_v7 = vpop.xlane.xlu1 %637 }
  0xad   : > { %vm641_vm12 = vcmp.eq.f32.partialorder %v638_v7, inf  ;;  %v644_v14 = vand.u32 2147483648, %v638_v7  ;;  %vm643_vm13 = vcmp.eq.f32.partialorder %v638_v7, 0.0 }
  0xd4   : > { %v351_v29 = vpop.f32.mrf.mxu0 }
  0xd5   : > { %v357_v30 = vadd.f32 %v351_v29, %v306_v28 }
  0xd6   : > { %v840_v31 = vpop.f32.mrf.mxu0 }
  0xd7   : > { %359 = vst.msk [vmem:[#allocation2] sm:$0x7] %vm299_vm4, %v357_v30 }
  0xd8   : > { %v354_v32 = vpop.f32.mrf.mxu0 }
  0xda   : > { %v841_v33 = vpop.f32.mrf.mxu0 }
  0xde   : > { %v372_v35 = vld [vmem:[#allocation2] sm:$0x7] }
 0x124   : > { %v378_v34 = vpop.permute.xlu0 %377 }
 0x125   : > { %905 = vrcp.f32 %v378_v34 }
 0x132   : > { %v906_v36 = vpop.eup %905 }
 0x133   : > { %v381_v37 = vmul.f32 %v906_v36, %v372_v35 }
 0x135   : > { %851 = vmatmul.mubr.msk.f32.vlgmr.msra.gmra.mxu1 %vm387_vm7, %v381_v37  ;;  %v467_v39 = vrot.slane %v381_v37, 1  ;;  %v549_v43 = vrot.slane %v381_v37, 2 }
 0x136   : > { %865 = vmatpush3.msra.mxu1 %v814_v38  ;;  %872 = vmatprep.mubr.msk.f32.mxu1 %vm942_vm0, %v941_v0 }
 0x137   : > { %866 = vmatprep.subr.mxu1 %v941_v0  ;;  %862 = vmatmul.mubr.msk.f32.vlgmr.msra.gmra.mxu0 %vm387_vm7, %v467_v39 }
 0x138   : > { %867 = vmatpush3.msra.mxu1 %v813_v40 }
 0x139   : > { %868 = vmatprep.subr.mxu1 %v941_v0 }
 0x13a   : > { %869 = vmatpush3.msra.mxu1 %v812_v41 }
 0x13b   : > { %870 = vmatprep.subr.mxu1 %v941_v0 }
 0x13c   : > { %871 = vmatpush3.msra.mxu1 %v811_v42 }
 0x13d   : > { %873 = vmatmul.mubr.msk.f32.vlgmr.msra.gmra.mxu1 %vm387_vm7, %v549_v43 }
 0x1f5   : > { %v457_v46 = vpop.f32.mrf.mxu1 }
 0x1f6   : > { %v458_v49 = vadd.f32 %v457_v46, %v382_v44 }
 0x1f7   : > { %v852_v47 = vpop.f32.mrf.mxu1  ;;  %v539_v48 = vpop.f32.mrf.mxu0 }
 0x1f8   : > { %v540_v50 = vadd.f32 %v539_v48, %v469_v45 }
 0x1f9   : > { %v863_v51 = vpop.f32.mrf.mxu0 }
 0x1fa   : > { %907 = vtanh.f32 %v540_v50 }
 0x1fb   : > { %909 = vtanh.f32 %v458_v49 }
 0x1fd   : > { %v620_v53 = vpop.f32.mrf.mxu1 }
 0x1fe   : > { %v621_v54 = vadd.f32 %v620_v53, %v550_v52 }
 0x1ff   : > { %v874_v55 = vpop.f32.mrf.mxu1 }
 0x200   : > { %911 = vtanh.f32 %v621_v54 }
 0x201   : > { %913 = vrsqrt.f32 %v649_v6 }
 0x202   : > { %915 = vrsqrt.f32 %v638_v7 }
 0x207   : > { %v908_v56 = vpop.eup %907 }
 0x208   : > { %v663_v57 = vsub.f32 %v1054_v19, %v908_v56  ;;  %v910_v58 = vpop.eup %909 }
 0x209   : > { %v682_v60 = vrot.slane %v910_v58, 7 }
 0x20a   : > { %v664_v59 = vmul.f32 %v663_v57, %v663_v57 }
 0x20b   : > { %v684_v1 = vsub.f32 %v1054_v19, %v682_v60 }
 0x20c   : > { %v665_v61 = vsel %vm635_vm6, %v664_v59, 0.0 }
 0x20d   : > { %v912_v62 = vpop.eup %911  ;;  %666 = vadd.xlane.f32.xlu1 %v665_v61  ;;  %v685_v4 = vmul.f32 %v684_v1, %v684_v1 }
 0x20e   : > { %v669_v63 = vrot.slane %v912_v62, 6  ;;  %v914_v8 = vpop.eup %913 }
 0x20f   : > { %v687_v5 = vsel %vm686_vm9, %v685_v4, 0.0  ;;  %v651_v9 = vmul.f32 %v914_v8, %v649_v6  ;;  %v916_v10 = vpop.eup %915 }
 0x210   : > { %v671_v0 = vsub.f32 %v1054_v19, %v669_v63  ;;  %v640_v13 = vmul.f32 %v916_v10, %v638_v7 }
 0x211   : > { %v653_v12 = vsel %vm652_vm10, %v649_v6, %v651_v9 }
 0x212   : > { %v672_v2 = vmul.f32 %v671_v0, %v671_v0  ;;  %v656_v15 = vsel %vm654_vm11, %v655_v11, %v653_v12  ;;  %v642_v16 = vsel %vm641_vm12, %v638_v7, %v640_v13 }
 0x213   : > { %v658_v17 = vrot.slane %v656_v15, 3  ;;  %v645_v19 = vsel %vm643_vm13, %v644_v14, %v642_v16 }
 0x214   : > { %v674_v3 = vsel %vm673_vm8, %v672_v2, 0.0 }
 0x215   : > { %675 = vadd.xlane.f32.xlu1 %v674_v3  ;;  %v660_v20 = vsub.f32 %v645_v19, %v658_v17 }
 0x217   : > { %v661_v23 = vadd.f32 1.0, %v660_v20 }
 0x219   : > { %688 = vadd.xlane.f32.xlu1 %v687_v5  ;;  %v662_v28 = vmax.f32 %v661_v23, 0.0 }
 0x21b   : > { %v695_v31 = vmul.f32 0.5, %v662_v28 }
 0x296   : > { %v667_v18 = vpop.xlane.xlu1 %666 }
 0x29e   : > { %v676_v21 = vpop.xlane.xlu1 %675 }
 0x29f   : > { %v678_v22 = vrot.slane %v676_v21, 2 }
 0x2a1   : > { %v680_v25 = vadd.f32 %v678_v22, %v667_v18 }
 0x2a2   : > { %v689_v24 = vpop.xlane.xlu1 %688 }
 0x2a3   : > { %v691_v26 = vrot.slane %v689_v24, 1 }
 0x2a5   : > { %v693_v27 = vadd.f32 %v691_v26, %v680_v25 }
 0x2a7   : > { %v696_v29 = vmul.f32 0.01, %v693_v27 }
 0x2a9   : > { %v698_v30 = vmul.f32 0.0078125, %v696_v29 }
 0x2ab   : > { %v699_v32 = vadd.f32 %v698_v30, %v695_v31 }
 0x2ad   : > { %702 = vperm.xlu1 %903, %v699_v32  }
 0x328   : > { %v703_v33 = vpop.permute.xlu1 %702 }
 0x329   : > { %705 = vst [vmem:[%s293_s15] sm:$0x1] %v703_v33 }
 0x32a PF: > { %s15_s20 = sadd.s32 1, %s939_s20   ;;  %s1107_s18 = smov %s935_s19 }
 0x32b   : > { %p12_p5 = scmp.ge.s32.totalorder %s15_s20, 4   ;;  %s1108_s19 = smov %s1110_s21 }
 0x32d   :  { %14 = sbr.rel (!%p12_p5) target bundleno = 2 (0x2), region = 86 }

</bundles_post_ra>
